<compile_context>
chip_gen: v7x
topology: tpu7x:2x2x1
jax: 0.10.0
libtpu: 0.0.40
codegen_flags: <defaults>
</compile_context>

<pallas_src>
import functools

import jax
import jax.numpy as jnp
from jax import lax
from jax.experimental import pallas as pl
from jax.experimental.pallas import tpu as pltpu


def _round_up(x, m):
    return ((x + m - 1) // m) * m


def _fused_ce_kernel(p1_ref, p2_ref, p3_ref, t1_ref, t2_ref, t3_ref,
                     out_ref, acc_ref, *, n_valid, tile_rows, n_heads3):
    """One grid step: CE-sum contribution of `tile_rows` batch rows, all heads."""
    i = pl.program_id(0)

    @pl.when(i == 0)
    def _init():
        acc_ref[...] = jnp.zeros_like(acc_ref)

    row0 = i * tile_rows  # first (unflattened) batch row handled by this tile

    def ce_sum_tile(logits_ref, tgt_ref, rows_per_batch_row, valid_rows):
        x = logits_ref[...].astype(jnp.float32)            # (R, C)
        t = tgt_ref[...]                                   # (R, 1) int32
        r, c = x.shape
        # Mask rows that are batch padding (batch rounded up to the tile size).
        row_ids = (row0 * rows_per_batch_row
                   + lax.broadcasted_iota(jnp.int32, (r, 1), 0))
        valid = row_ids < valid_rows                       # (R, 1) bool
        # Numerically stable log-sum-exp per row.
        row_max = jnp.max(x, axis=-1, keepdims=True)
        lse = jnp.log(jnp.sum(jnp.exp(x - row_max), axis=-1,
                              keepdims=True)) + row_max    # (R, 1)
        # Target logit via one-hot mask (no dynamic gather on TPU).
        col_ids = lax.broadcasted_iota(jnp.int32, (r, c), 1)
        onehot = (col_ids == t) & valid                    # (R, C)
        # Full reduces straight to (1,1) partial sums.
        lse_sum = jnp.sum(jnp.where(valid, lse, 0.0), keepdims=True)   # (1,1)
        tgt_sum = jnp.sum(jnp.where(onehot, x, 0.0), keepdims=True)    # (1,1)
        return lse_sum - tgt_sum

    tile_loss = ce_sum_tile(p1_ref, t1_ref, 1, n_valid)
    tile_loss = tile_loss + ce_sum_tile(p2_ref, t2_ref, 1, n_valid)
    tile_loss = tile_loss + ce_sum_tile(p3_ref, t3_ref, n_heads3,
                                        n_valid * n_heads3)

    acc_ref[...] = acc_ref[...] + tile_loss

    @pl.when(i == pl.num_programs(0) - 1)
    def _finalize():
        out_ref[...] = acc_ref[...]


def alpnet_loss(pred, target, *, tile_rows=None):
    """JAX/Pallas equivalent of AlpNetLoss.forward.

    pred   : tuple (p1, p2, p3) with shapes (B,C1), (B,C2), (B,5,C3)
    target : (B, 7) integer class indices
    """
    p1, p2, p3 = pred
    B, C1 = p1.shape
    C2 = p2.shape[1]
    NH, C3 = p3.shape[1], p3.shape[2]

    tgt = target.astype(jnp.int32)
    t1 = tgt[:, 0:1]                              # (B, 1)
    t2 = tgt[:, 1:2]                              # (B, 1)
    t3 = tgt[:, 2:2 + NH].reshape(B * NH, 1)      # (B*NH, 1), matches p3 flatten
    p3f = p3.reshape(B * NH, C3)                  # (B*NH, C3)

    # Row tiles: multiple of 8 (sublane), large (<=1024) to amortize the
    # ~0.35us/step overhead.  Double-buffered VMEM use per step is
    # TN*(C1+C2+NH*C3)*4*2 bytes (~2 MiB at TN=1024, C~35), well under the
    # v5e 16 MiB scoped / v7x 64 MiB physical VMEM budgets.
    if tile_rows is None:
        tile_rows = min(1024, _round_up(B, 8))
    TN = max(8, _round_up(tile_rows, 8))
    n_blocks = -(-B // TN)
    Bp = n_blocks * TN

    if Bp != B:  # pad batch; padded rows masked in-kernel via n_valid
        pad = Bp - B
        p1 = jnp.pad(p1, ((0, pad), (0, 0)))
        p2 = jnp.pad(p2, ((0, pad), (0, 0)))
        p3f = jnp.pad(p3f, ((0, pad * NH), (0, 0)))
        t1 = jnp.pad(t1, ((0, pad), (0, 0)))
        t2 = jnp.pad(t2, ((0, pad), (0, 0)))
        t3 = jnp.pad(t3, ((0, pad * NH), (0, 0)))

    kernel = functools.partial(_fused_ce_kernel, n_valid=B, tile_rows=TN,
                               n_heads3=NH)

    rb = lambda i: (i, 0)  # shared row-block index map

    n_logit_elems = p1.size + p2.size + p3f.size
    cost = pl.CostEstimate(
        flops=8 * n_logit_elems,
        transcendentals=n_logit_elems,
        bytes_accessed=(p1.size * p1.dtype.itemsize
                        + p2.size * p2.dtype.itemsize
                        + p3f.size * p3f.dtype.itemsize
                        + 4 * (t1.size + t2.size + t3.size) + 4),
    )

    out = pl.pallas_call(
        kernel,
        out_shape=jax.ShapeDtypeStruct((1, 1), jnp.float32),
        grid_spec=pltpu.PrefetchScalarGridSpec(
            num_scalar_prefetch=0,
            grid=(n_blocks,),
            in_specs=[
                pl.BlockSpec((TN, C1), rb),
                pl.BlockSpec((TN, C2), rb),
                pl.BlockSpec((TN * NH, C3), rb),
                pl.BlockSpec((TN, 1), rb),
                pl.BlockSpec((TN, 1), rb),
                pl.BlockSpec((TN * NH, 1), rb),
            ],
            out_specs=pl.BlockSpec((1, 1), lambda i: (0, 0)),
            scratch_shapes=[pltpu.VMEM((1, 1), jnp.float32)],
        ),
        compiler_params=pltpu.CompilerParams(
            dimension_semantics=("arbitrary",)),
        cost_estimate=cost,
    )(p1, p2, p3f, t1, t2, t3)

    return out[0, 0]


def _alpnet_loss_ref(pred, target):
    """Pure-JAX reference for verification."""
    def ce(logits, t):
        logp = jax.nn.log_softmax(logits.astype(jnp.float32), axis=-1)
        return -jnp.sum(jnp.take_along_axis(
            logp, t[:, None].astype(jnp.int32), axis=-1))
    p1, p2, p3 = pred
    loss = ce(p1, target[:, 0]) + ce(p2, target[:, 1])
    for i in range(p3.shape[1]):
        loss = loss + ce(p3[:, i], target[:, i + 2])
    return loss


if __name__ == "__main__":
    # small, deterministic synthetic shapes (license-plate style heads);
    # B=20 is deliberately not a multiple of 8 to exercise padding + masking.
    B, C1, C2, C3, NH = 20, 34, 25, 35, 5
    key = jax.random.PRNGKey(0)
    k1, k2, k3, kt0, kt1, kt2 = jax.random.split(key, 6)

    p1 = jax.random.normal(k1, (B, C1), dtype=jnp.float32)
    p2 = jax.random.normal(k2, (B, C2), dtype=jnp.float32)
    p3 = jax.random.normal(k3, (B, NH, C3), dtype=jnp.float32)

    t0 = jax.random.randint(kt0, (B, 1), 0, C1, dtype=jnp.int32)
    t1 = jax.random.randint(kt1, (B, 1), 0, C2, dtype=jnp.int32)
    t2 = jax.random.randint(kt2, (B, NH), 0, C3, dtype=jnp.int32)
    target = jnp.concatenate([t0, t1, t2], axis=1)          # (B, 7)

    ref = _alpnet_loss_ref((p1, p2, p3), target)

    # default tiling (single grid step at this batch size)
    loss = jax.block_until_ready(alpnet_loss((p1, p2, p3), target))
    assert jnp.allclose(loss, ref, rtol=1e-5, atol=1e-4), (loss, ref)

    # small tiles -> multi-step grid, resident accumulator and row masking
    loss_t = jax.block_until_ready(
        alpnet_loss((p1, p2, p3), target, tile_rows=8))
    assert jnp.allclose(loss_t, ref, rtol=1e-5, atol=1e-4), (loss_t, ref)

    print("KERNEL_OK")
</pallas_src>

<mosaic_0001>
module attributes {stable_mosaic.version = 11 : i64} {
  func.func @_fused_ce_kernel(%arg0: i32, %arg1: memref<24x34xf32, #tpu.memory_space<vmem>>, %arg2: memref<24x25xf32, #tpu.memory_space<vmem>>, %arg3: memref<120x35xf32, #tpu.memory_space<vmem>>, %arg4: memref<24x1xi32, #tpu.memory_space<vmem>>, %arg5: memref<24x1xi32, #tpu.memory_space<vmem>>, %arg6: memref<120x1xi32, #tpu.memory_space<vmem>>, %arg7: memref<1x1xf32, #tpu.memory_space<vmem>>, %arg8: memref<1x1xf32, #tpu.memory_space<vmem>>) attributes {dimension_semantics = [#tpu.dimension_semantics<arbitrary>], iteration_bounds = array<i64: 1>, scalar_prefetch = 0 : i64, scratch_operands = 1 : i64, tpu.core_type = #tpu.core_type<tc>, window_params = [{transform_indices = @transform_0, window_bounds = array<i64: 24, 34>}, {transform_indices = @transform_1, window_bounds = array<i64: 24, 25>}, {transform_indices = @transform_2, window_bounds = array<i64: 120, 35>}, {transform_indices = @transform_3, window_bounds = array<i64: 24, 1>}, {transform_indices = @transform_4, window_bounds = array<i64: 24, 1>}, {transform_indices = @transform_5, window_bounds = array<i64: 120, 1>}, {pipeline_mode = #tpu.pipeline_mode<synchronous>, transform_indices = @transform_6, window_bounds = array<i64: 1, 1>}]} {
    %c0_i32 = arith.constant 0 : i32
    %0 = arith.cmpi eq, %arg0, %c0_i32 : i32
    %1 = arith.extui %0 : i1 to i32
    %c0_i32_0 = arith.constant 0 : i32
    %2 = arith.cmpi ne, %1, %c0_i32_0 : i32
    scf.if %2 {
      %cst_37 = arith.constant 0.000000e+00 : f32
      %123 = vector.broadcast %cst_37 : f32 to vector<1x1xf32>
      %c0_38 = arith.constant 0 : index
      %c0_39 = arith.constant 0 : index
      %124 = vector.load %arg8[%c0_38, %c0_39] : memref<1x1xf32, #tpu.memory_space<vmem>>, vector<1x1xf32>
      tpu.vector_store %arg8[%c0_38, %c0_39], %123 {strides = array<i32>} : memref<1x1xf32, #tpu.memory_space<vmem>>, vector<1x1xf32>,
    } else {
    }
    %c24_i32 = arith.constant 24 : i32
    %3 = arith.muli %arg0, %c24_i32 : i32
    %c0 = arith.constant 0 : index
    %c0_1 = arith.constant 0 : index
    %4 = vector.load %arg1[%c0, %c0_1] : memref<24x34xf32, #tpu.memory_space<vmem>>, vector<24x34xf32>
    %c0_2 = arith.constant 0 : index
    %c0_3 = arith.constant 0 : index
    %5 = vector.load %arg4[%c0_2, %c0_3] : memref<24x1xi32, #tpu.memory_space<vmem>>, vector<24x1xi32>
    %c1_i32 = arith.constant 1 : i32
    %6 = arith.muli %3, %c1_i32 : i32
    %7 = tpu.iota {dimensions = array<i32: 0>} : vector<24x1xi32>
    %8 = vector.broadcast %6 : i32 to vector<24x1xi32>
    %9 = arith.addi %8, %7 : vector<24x1xi32>
    %c20_i32 = arith.constant 20 : i32
    %10 = vector.broadcast %c20_i32 : i32 to vector<24x1xi32>
    %11 = arith.cmpi slt, %9, %10 : vector<24x1xi32>
    %cst = arith.constant dense<0xFF800000> : vector<24xf32>
    %12 = vector.multi_reduction <maximumf>, %4, %cst [1] : vector<24x34xf32> to vector<24xf32>
    %13 = vector.shape_cast %12 : vector<24xf32> to vector<24x1xf32>
    %14 = vector.broadcast %13 : vector<24x1xf32> to vector<24x34xf32>
    %15 = arith.subf %4, %14 : vector<24x34xf32>
    %16 = math.exp %15 : vector<24x34xf32>
    %cst_4 = arith.constant dense<0.000000e+00> : vector<24xf32>
    %17 = vector.multi_reduction <add>, %16, %cst_4 [1] : vector<24x34xf32> to vector<24xf32>
    %18 = vector.shape_cast %17 : vector<24xf32> to vector<24x1xf32>
    %19 = math.log %18 : vector<24x1xf32>
    %20 = arith.addf %19, %13 : vector<24x1xf32>
    %21 = tpu.iota {dimensions = array<i32: 1>} : vector<24x34xi32>
    %22 = vector.broadcast %5 : vector<24x1xi32> to vector<24x34xi32>
    %23 = arith.cmpi eq, %21, %22 : vector<24x34xi32>
    %24 = vector.broadcast %11 : vector<24x1xi1> to vector<24x34xi1>
    %25 = arith.andi %23, %24 : vector<24x34xi1>
    %cst_5 = arith.constant 0.000000e+00 : f32
    %26 = vector.broadcast %cst_5 : f32 to vector<24x1xf32>
    %27 = arith.select %11, %20, %26 : vector<24x1xi1>, vector<24x1xf32>
    %28 = vector.shape_cast %27 : vector<24x1xf32> to vector<1x24x1xf32>
    %cst_6 = arith.constant dense<0.000000e+00> : vector<1xf32>
    %29 = vector.multi_reduction <add>, %28, %cst_6 [1, 2] : vector<1x24x1xf32> to vector<1xf32>
    %30 = vector.shape_cast %29 : vector<1xf32> to vector<1x1x1xf32>
    %31 = vector.extract %30[0, 0, 0] : f32 from vector<1x1x1xf32>
    %32 = vector.broadcast %31 : f32 to vector<1x1xf32>
    %cst_7 = arith.constant 0.000000e+00 : f32
    %33 = vector.broadcast %cst_7 : f32 to vector<24x34xf32>
    %34 = arith.select %25, %4, %33 : vector<24x34xi1>, vector<24x34xf32>
    %35 = vector.shape_cast %34 : vector<24x34xf32> to vector<1x24x34xf32>
    %cst_8 = arith.constant dense<0.000000e+00> : vector<1xf32>
    %36 = vector.multi_reduction <add>, %35, %cst_8 [1, 2] : vector<1x24x34xf32> to vector<1xf32>
    %37 = vector.shape_cast %36 : vector<1xf32> to vector<1x1x1xf32>
    %38 = vector.extract %37[0, 0, 0] : f32 from vector<1x1x1xf32>
    %39 = vector.broadcast %38 : f32 to vector<1x1xf32>
    %40 = arith.subf %32, %39 : vector<1x1xf32>
    %c0_9 = arith.constant 0 : index
    %c0_10 = arith.constant 0 : index
    %41 = vector.load %arg2[%c0_9, %c0_10] : memref<24x25xf32, #tpu.memory_space<vmem>>, vector<24x25xf32>
    %c0_11 = arith.constant 0 : index
    %c0_12 = arith.constant 0 : index
    %42 = vector.load %arg5[%c0_11, %c0_12] : memref<24x1xi32, #tpu.memory_space<vmem>>, vector<24x1xi32>
    %c1_i32_13 = arith.constant 1 : i32
    %43 = arith.muli %3, %c1_i32_13 : i32
    %44 = tpu.iota {dimensions = array<i32: 0>} : vector<24x1xi32>
    %45 = vector.broadcast %43 : i32 to vector<24x1xi32>
    %46 = arith.addi %45, %44 : vector<24x1xi32>
    %c20_i32_14 = arith.constant 20 : i32
    %47 = vector.broadcast %c20_i32_14 : i32 to vector<24x1xi32>
    %48 = arith.cmpi slt, %46, %47 : vector<24x1xi32>
    %cst_15 = arith.constant dense<0xFF800000> : vector<24xf32>
    %49 = vector.multi_reduction <maximumf>, %41, %cst_15 [1] : vector<24x25xf32> to vector<24xf32>
    %50 = vector.shape_cast %49 : vector<24xf32> to vector<24x1xf32>
    %51 = vector.broadcast %50 : vector<24x1xf32> to vector<24x25xf32>
    %52 = arith.subf %41, %51 : vector<24x25xf32>
    %53 = math.exp %52 : vector<24x25xf32>
    %cst_16 = arith.constant dense<0.000000e+00> : vector<24xf32>
    %54 = vector.multi_reduction <add>, %53, %cst_16 [1] : vector<24x25xf32> to vector<24xf32>
    %55 = vector.shape_cast %54 : vector<24xf32> to vector<24x1xf32>
    %56 = math.log %55 : vector<24x1xf32>
    %57 = arith.addf %56, %50 : vector<24x1xf32>
    %58 = tpu.iota {dimensions = array<i32: 1>} : vector<24x25xi32>
    %59 = vector.broadcast %42 : vector<24x1xi32> to vector<24x25xi32>
    %60 = arith.cmpi eq, %58, %59 : vector<24x25xi32>
    %61 = vector.broadcast %48 : vector<24x1xi1> to vector<24x25xi1>
    %62 = arith.andi %60, %61 : vector<24x25xi1>
    %cst_17 = arith.constant 0.000000e+00 : f32
    %63 = vector.broadcast %cst_17 : f32 to vector<24x1xf32>
    %64 = arith.select %48, %57, %63 : vector<24x1xi1>, vector<24x1xf32>
    %65 = vector.shape_cast %64 : vector<24x1xf32> to vector<1x24x1xf32>
    %cst_18 = arith.constant dense<0.000000e+00> : vector<1xf32>
    %66 = vector.multi_reduction <add>, %65, %cst_18 [1, 2] : vector<1x24x1xf32> to vector<1xf32>
    %67 = vector.shape_cast %66 : vector<1xf32> to vector<1x1x1xf32>
    %68 = vector.extract %67[0, 0, 0] : f32 from vector<1x1x1xf32>
    %69 = vector.broadcast %68 : f32 to vector<1x1xf32>
    %cst_19 = arith.constant 0.000000e+00 : f32
    %70 = vector.broadcast %cst_19 : f32 to vector<24x25xf32>
    %71 = arith.select %62, %41, %70 : vector<24x25xi1>, vector<24x25xf32>
    %72 = vector.shape_cast %71 : vector<24x25xf32> to vector<1x24x25xf32>
    %cst_20 = arith.constant dense<0.000000e+00> : vector<1xf32>
    %73 = vector.multi_reduction <add>, %72, %cst_20 [1, 2] : vector<1x24x25xf32> to vector<1xf32>
    %74 = vector.shape_cast %73 : vector<1xf32> to vector<1x1x1xf32>
    %75 = vector.extract %74[0, 0, 0] : f32 from vector<1x1x1xf32>
    %76 = vector.broadcast %75 : f32 to vector<1x1xf32>
    %77 = arith.subf %69, %76 : vector<1x1xf32>
    %78 = arith.addf %40, %77 : vector<1x1xf32>
    %c0_21 = arith.constant 0 : index
    %c0_22 = arith.constant 0 : index
    %79 = vector.load %arg3[%c0_21, %c0_22] : memref<120x35xf32, #tpu.memory_space<vmem>>, vector<120x35xf32>
    %c0_23 = arith.constant 0 : index
    %c0_24 = arith.constant 0 : index
    %80 = vector.load %arg6[%c0_23, %c0_24] : memref<120x1xi32, #tpu.memory_space<vmem>>, vector<120x1xi32>
    %c5_i32 = arith.constant 5 : i32
    %81 = arith.muli %3, %c5_i32 : i32
    %82 = tpu.iota {dimensions = array<i32: 0>} : vector<120x1xi32>
    %83 = vector.broadcast %81 : i32 to vector<120x1xi32>
    %84 = arith.addi %83, %82 : vector<120x1xi32>
    %c100_i32 = arith.constant 100 : i32
    %85 = vector.broadcast %c100_i32 : i32 to vector<120x1xi32>
    %86 = arith.cmpi slt, %84, %85 : vector<120x1xi32>
    %cst_25 = arith.constant dense<0xFF800000> : vector<120xf32>
    %87 = vector.multi_reduction <maximumf>, %79, %cst_25 [1] : vector<120x35xf32> to vector<120xf32>
    %88 = vector.shape_cast %87 : vector<120xf32> to vector<120x1xf32>
    %89 = vector.broadcast %88 : vector<120x1xf32> to vector<120x35xf32>
    %90 = arith.subf %79, %89 : vector<120x35xf32>
    %91 = math.exp %90 : vector<120x35xf32>
    %cst_26 = arith.constant dense<0.000000e+00> : vector<120xf32>
    %92 = vector.multi_reduction <add>, %91, %cst_26 [1] : vector<120x35xf32> to vector<120xf32>
    %93 = vector.shape_cast %92 : vector<120xf32> to vector<120x1xf32>
    %94 = math.log %93 : vector<120x1xf32>
    %95 = arith.addf %94, %88 : vector<120x1xf32>
    %96 = tpu.iota {dimensions = array<i32: 1>} : vector<120x35xi32>
    %97 = vector.broadcast %80 : vector<120x1xi32> to vector<120x35xi32>
    %98 = arith.cmpi eq, %96, %97 : vector<120x35xi32>
    %99 = vector.broadcast %86 : vector<120x1xi1> to vector<120x35xi1>
    %100 = arith.andi %98, %99 : vector<120x35xi1>
    %cst_27 = arith.constant 0.000000e+00 : f32
    %101 = vector.broadcast %cst_27 : f32 to vector<120x1xf32>
    %102 = arith.select %86, %95, %101 : vector<120x1xi1>, vector<120x1xf32>
    %103 = vector.shape_cast %102 : vector<120x1xf32> to vector<1x120x1xf32>
    %cst_28 = arith.constant dense<0.000000e+00> : vector<1xf32>
    %104 = vector.multi_reduction <add>, %103, %cst_28 [1, 2] : vector<1x120x1xf32> to vector<1xf32>
    %105 = vector.shape_cast %104 : vector<1xf32> to vector<1x1x1xf32>
    %106 = vector.extract %105[0, 0, 0] : f32 from vector<1x1x1xf32>
    %107 = vector.broadcast %106 : f32 to vector<1x1xf32>
    %cst_29 = arith.constant 0.000000e+00 : f32
    %108 = vector.broadcast %cst_29 : f32 to vector<120x35xf32>
    %109 = arith.select %100, %79, %108 : vector<120x35xi1>, vector<120x35xf32>
    %110 = vector.shape_cast %109 : vector<120x35xf32> to vector<1x120x35xf32>
    %cst_30 = arith.constant dense<0.000000e+00> : vector<1xf32>
    %111 = vector.multi_reduction <add>, %110, %cst_30 [1, 2] : vector<1x120x35xf32> to vector<1xf32>
    %112 = vector.shape_cast %111 : vector<1xf32> to vector<1x1x1xf32>
    %113 = vector.extract %112[0, 0, 0] : f32 from vector<1x1x1xf32>
    %114 = vector.broadcast %113 : f32 to vector<1x1xf32>
    %115 = arith.subf %107, %114 : vector<1x1xf32>
    %116 = arith.addf %78, %115 : vector<1x1xf32>
    %c0_31 = arith.constant 0 : index
    %c0_32 = arith.constant 0 : index
    %117 = vector.load %arg8[%c0_31, %c0_32] : memref<1x1xf32, #tpu.memory_space<vmem>>, vector<1x1xf32>
    %118 = arith.addf %117, %116 : vector<1x1xf32>
    %c0_33 = arith.constant 0 : index
    %c0_34 = arith.constant 0 : index
    %119 = vector.load %arg8[%c0_33, %c0_34] : memref<1x1xf32, #tpu.memory_space<vmem>>, vector<1x1xf32>
    tpu.vector_store %arg8[%c0_33, %c0_34], %118 {strides = array<i32>} : memref<1x1xf32, #tpu.memory_space<vmem>>, vector<1x1xf32>,
    %c0_i32_35 = arith.constant 0 : i32
    %120 = arith.cmpi eq, %arg0, %c0_i32_35 : i32
    %121 = arith.extui %120 : i1 to i32
    %c0_i32_36 = arith.constant 0 : i32
    %122 = arith.cmpi ne, %121, %c0_i32_36 : i32
    scf.if %122 {
      %c0_37 = arith.constant 0 : index
      %c0_38 = arith.constant 0 : index
      %123 = vector.load %arg8[%c0_37, %c0_38] : memref<1x1xf32, #tpu.memory_space<vmem>>, vector<1x1xf32>
      %c0_39 = arith.constant 0 : index
      %c0_40 = arith.constant 0 : index
      %124 = vector.load %arg7[%c0_39, %c0_40] : memref<1x1xf32, #tpu.memory_space<vmem>>, vector<1x1xf32>
      tpu.vector_store %arg7[%c0_39, %c0_40], %123 {strides = array<i32>} : memref<1x1xf32, #tpu.memory_space<vmem>>, vector<1x1xf32>,
    } else {
    }
    return
  }
  func.func @transform_0(%arg0: i32) -> (i32, i32) {
    %c0_i32 = arith.constant 0 : i32
    %c0_i32_0 = arith.constant 0 : i32
    return %arg0, %c0_i32 : i32, i32
  }
  func.func @transform_1(%arg0: i32) -> (i32, i32) {
    %c0_i32 = arith.constant 0 : i32
    %c0_i32_0 = arith.constant 0 : i32
    return %arg0, %c0_i32 : i32, i32
  }
  func.func @transform_2(%arg0: i32) -> (i32, i32) {
    %c0_i32 = arith.constant 0 : i32
    %c0_i32_0 = arith.constant 0 : i32
    return %arg0, %c0_i32 : i32, i32
  }
  func.func @transform_3(%arg0: i32) -> (i32, i32) {
    %c0_i32 = arith.constant 0 : i32
    %c0_i32_0 = arith.constant 0 : i32
    return %arg0, %c0_i32 : i32, i32
  }
  func.func @transform_4(%arg0: i32) -> (i32, i32) {
    %c0_i32 = arith.constant 0 : i32
    %c0_i32_0 = arith.constant 0 : i32
    return %arg0, %c0_i32 : i32, i32
  }
  func.func @transform_5(%arg0: i32) -> (i32, i32) {
    %c0_i32 = arith.constant 0 : i32
    %c0_i32_0 = arith.constant 0 : i32
    return %arg0, %c0_i32 : i32, i32
  }
  func.func @transform_6(%arg0: i32) -> (i32, i32) {
    %c0_i32 = arith.constant 0 : i32
    %c0_i32_0 = arith.constant 0 : i32
    %c0_i32_1 = arith.constant 0 : i32
    return %c0_i32, %c0_i32_0 : i32, i32
  }
}

</mosaic_0001>

<bundles_post_ra>
// kernel: tpu_custom_call.1
= control target key start
LH: loop header
LB: loop body
LE: loop exit
PB: predicated region body
PF: predicated region fallthrough
CT: control target
= control target key end

     0   :  { %vm316_vm0 = vcmask 285696   ;;  %v852_v12 = vmov 0   ;;  %s1315_s0 = inlined_call_operand.vmem [shape: f32[24,34], index: 0, kind: input, shape index: {}]   ;;  %s1316_s1 = inlined_call_operand.vmem [shape: f32[24,25], index: 1, kind: input, shape index: {}]   ;;  %s1317_s2 = inlined_call_operand.vmem [shape: f32[120,35], index: 2, kind: input, shape index: {}]   ;;  %s1318_s3 = inlined_call_operand.vmem [shape: s32[24,1], index: 3, kind: input, shape index: {}]   ;;  %s1319_s4 = inlined_call_operand.vmem [shape: s32[24,1], index: 4, kind: input, shape index: {}]   ;;  %s1320_s5 = inlined_call_operand.vmem [shape: s32[120,1], index: 5, kind: input, shape index: {}]   ;;  %s1321_s6 = inlined_call_operand.hbm [shape: f32[1,1], index: 6, kind: output, shape index: {}]  }
   0x1   :  { %v893_v0 = vld [vmem:[%s1317_s2] sm:$0xff]  ;;  %v898_v1 = vld [vmem:[%s1317_s2 + $0x10] sm:$0xff]  ;;  %v903_v2 = vld [vmem:[%s1317_s2 + $0x8] sm:$0xff]  ;;  %751 = vset.pattern.permute.xlu0 %v852_v12  ;;  %750 = vset.pattern.permute.xlu1 %v852_v12 }
   0x2   :  { %v317_v3 = vsel %vm316_vm0, %v893_v0, -inf  ;;  %v323_v4 = vsel %vm316_vm0, %v898_v1, -inf  ;;  %v912_v5 = vld [vmem:[%s1317_s2 + $0x18] sm:$0xff]  ;;  %v320_v6 = vsel %vm316_vm0, %v903_v2, -inf  ;;  %v921_v8 = vld [vmem:[%s1317_s2 + $0x20] sm:$0xff]  ;;  %v926_v9 = vld [vmem:[%s1317_s2 + $0x28] sm:$0xff] }
   0x3   :  { %318 = vmax.xlane.f32.xlu0 %v317_v3  ;;  %324 = vmax.xlane.f32.xlu1 %v323_v4  ;;  %v326_v7 = vsel %vm316_vm0, %v912_v5, -inf  ;;  %v329_v10 = vsel %vm316_vm0, %v921_v8, -inf  ;;  %v332_v11 = vsel %vm316_vm0, %v926_v9, -inf  ;;  %v935_v13 = vld [vmem:[%s1317_s2 + $0x30] sm:$0xff]  ;;  %v940_v14 = vld [vmem:[%s1317_s2 + $0x38] sm:$0xff]  ;;  %v949_v17 = vld [vmem:[%s1317_s2 + $0x40] sm:$0xff] }
   0x4   :  { %v335_v15 = vsel %vm316_vm0, %v935_v13, -inf  ;;  %v338_v16 = vsel %vm316_vm0, %v940_v14, -inf  ;;  %v954_v18 = vld [vmem:[%s1317_s2 + $0x48] sm:$0xff] }
   0x7   :  { %321 = vmax.xlane.f32.xlu0 %v320_v6  ;;  %327 = vmax.xlane.f32.xlu1 %v326_v7 }
   0xb   :  { %330 = vmax.xlane.f32.xlu0 %v329_v10  ;;  %333 = vmax.xlane.f32.xlu1 %v332_v11 }
   0xc   :  { %11 = vsyncpa [#allocation4], 0  ;;  %v341_v19 = vsel %vm316_vm0, %v949_v17, -inf  ;;  %v344_v20 = vsel %vm316_vm0, %v954_v18, -inf  ;;  %v963_v21 = vld [vmem:[%s1315_s0] sm:$0xff]  ;;  %vm48_vm1 = vcmask 277504  }
   0xd   :  { %v968_v22 = vld [vmem:[%s1315_s0 + $0x8] sm:$0xff]  ;;  %v49_v23 = vsel %vm48_vm1, %v963_v21, -inf  ;;  %v977_v25 = vld [vmem:[%s1316_s1] sm:$0xff]  ;;  %vm152_vm2 = vcmask 203776   ;;  %v991_v29 = vld [vmem:[%s1317_s2 + $0x50] sm:$0xff]  ;;  %s854_s22 = smov [#allocation3]  }
   0xe   :  { %v52_v24 = vsel %vm48_vm1, %v968_v22, -inf  ;;  %v982_v26 = vld [vmem:[%s1316_s1 + $0x8] sm:$0xff]  ;;  %v153_v27 = vsel %vm152_vm2, %v977_v25, -inf  ;;  %v996_v30 = vld [vmem:[%s1315_s0 + $0x10] sm:$0xff]  ;;  %v347_v31 = vsel %vm316_vm0, %v991_v29, -inf  ;;  %v1010_v34 = vld [vmem:[%s1317_s2 + $0x58] sm:$0xff] }
   0xf   :  { %336 = vmax.xlane.f32.xlu0 %v335_v15  ;;  %339 = vmax.xlane.f32.xlu1 %v338_v16  ;;  %v156_v28 = vsel %vm152_vm2, %v982_v26, -inf  ;;  %v55_v32 = vsel %vm48_vm1, %v996_v30, -inf  ;;  %v1005_v33 = vld [vmem:[%s1316_s1 + $0x10] sm:$0xff]  ;;  %v350_v36 = vsel %vm316_vm0, %v1010_v34, -inf  ;;  %v1019_v37 = vld [vmem:[%s1317_s2 + $0x60] sm:$0xff]  ;;  %v266_v41 = vld [vmem:[%s1320_s5 + $0x48] sm:$0xff] }
  0x10   :  { %v159_v35 = vsel %vm152_vm2, %v1005_v33, -inf  ;;  %v353_v38 = vsel %vm316_vm0, %v1019_v37, -inf  ;;  %v257_v39 = vld [vmem:[%s1320_s5] sm:$0xff]  ;;  %v258_v42 = vld [vmem:[%s1320_s5 + $0x8] sm:$0xff]  ;;  %v259_v44 = vld [vmem:[%s1320_s5 + $0x10] sm:$0xff]  ;;  %s727_s23 = sshll.u32 %s854_s22, 4  ;;  %s728_s23 = int_to_ptr.vmem [resolvable:$true] %s727_s23 }
  0x11   :  { %v261_v40 = vld [vmem:[%s1320_s5 + $0x20] sm:$0xff]  ;;  %v35_v43 = vld [vmem:[%s1318_s3 + $0x8] sm:$0xff]  ;;  %v260_v46 = vld [vmem:[%s1320_s5 + $0x18] sm:$0xff]  ;;  %s828_s24 = scalar_lea.vmem %s728_s23, 16  ;;  %s832_s25 = scalar_lea.vmem %s728_s23, 32 }
  0x12   :  { %v150_v45 = vld [vmem:[%s1319_s4 + $0x8] sm:$0xff]  ;;  %v36_v47 = vld [vmem:[%s1318_s3 + $0x10] sm:$0xff]  ;;  %v264_v50 = vld [vmem:[%s1320_s5 + $0x38] sm:$0xff]  ;;  %p829_p0 = scmp.ne.s32.totalorder %s728_s23, %s828_s24  ;;  %p833_p1 = scmp.lt.s32.totalorder %s728_s23, %s728_s23 }
  0x13   :  { %342 = vmax.xlane.f32.xlu0 %v341_v19  ;;  %345 = vmax.xlane.f32.xlu1 %v344_v20  ;;  %v262_v48 = vld [vmem:[%s1320_s5 + $0x28] sm:$0xff]  ;;  %v263_v49 = vld [vmem:[%s1320_s5 + $0x30] sm:$0xff]  ;;  %v265_v51 = vld [vmem:[%s1320_s5 + $0x40] sm:$0xff]  ;;  %p834_p2 = scmp.lt.s32.totalorder %s832_s25, %s828_s24 }
  0x14   :  { %v34_v52 = vld [vmem:[%s1318_s3] sm:$0xff]  ;;  %v267_v54 = vld [vmem:[%s1320_s5 + $0x50] sm:$0xff] }
  0x15   :  { %v149_v53 = vld [vmem:[%s1319_s4] sm:$0xff]  ;;  %v151_v55 = vld [vmem:[%s1319_s4 + $0x10] sm:$0xff]  ;;  %p835_p3 = por %p834_p2, %p833_p1 }
  0x17   :  { %50 = vmax.xlane.f32.xlu0 %v49_v23  ;;  %53 = vmax.xlane.f32.xlu1 %v52_v24  ;;  %p836_p4 = pnand %p835_p3, %p829_p0 }
  0x1b   :  { %154 = vmax.xlane.f32.xlu0 %v153_v27  ;;  %157 = vmax.xlane.f32.xlu1 %v156_v28 }
  0x1f   :  { %348 = vmax.xlane.f32.xlu0 %v347_v31  ;;  %56 = vmax.xlane.f32.xlu1 %v55_v32 }
  0x23   :  { %160 = vmax.xlane.f32.xlu0 %v159_v35  ;;  %351 = vmax.xlane.f32.xlu1 %v350_v36 }
  0x27   :  { %354 = vmax.xlane.f32.xlu0 %v353_v38 }
  0x34   :  { %498 = vperm.xlu1 %750, %v257_v39  }
  0x38   :  { %510 = vperm.xlu1 %750, %v261_v40  }
  0x3c   :  { %525 = vperm.xlu1 %750, %v266_v41  }
  0x3d   :  { %501 = vperm.xlu0 %751, %v258_v42  }
  0x40   :  { %91 = vperm.xlu1 %750, %v35_v43  }
  0x41   :  { %504 = vperm.xlu0 %751, %v259_v44  }
  0x44   :  { %193 = vperm.xlu1 %750, %v150_v45  }
  0x45   :  { %507 = vperm.xlu0 %751, %v260_v46  }
  0x48   :  { %94 = vperm.xlu1 %750, %v36_v47  }
  0x49   :  { %513 = vperm.xlu0 %751, %v262_v48  }
  0x4d   :  { %516 = vperm.xlu0 %751, %v263_v49  }
  0x51   :  { %519 = vperm.xlu0 %751, %v264_v50  }
  0x55   :  { %522 = vperm.xlu0 %751, %v265_v51  }
  0x59   :  { %88 = vperm.xlu0 %751, %v34_v52  }
  0x5d   :  { %190 = vperm.xlu0 %751, %v149_v53  }
  0x61   :  { %528 = vperm.xlu0 %751, %v267_v54  }
  0x65   :  { %196 = vperm.xlu0 %751, %v151_v55  }
  0x90   :  { %v1074_v56 = vpop.xlane.xlu0 %318  ;;  %v1076_v57 = vpop.xlane.xlu1 %324 }
  0x91   :  { %v362_v58 = vsub.f32 %v893_v0, %v1074_v56  ;;  %v364_v59 = vsub.f32 %v898_v1, %v1076_v57 }
  0x93   :  { %v377_v60 = vmul.f32 1.442695, %v362_v58  ;;  %v381_v61 = vmul.f32 1.442695, %v364_v59 }
  0x94   :  { %v1082_v62 = vpop.xlane.xlu0 %321  ;;  %v1084_v63 = vpop.xlane.xlu1 %327 }
  0x95   :  { %752 = vpow2.f32 %v377_v60  ;;  %v363_v3 = vsub.f32 %v903_v2, %v1082_v62  ;;  %v365_v4 = vsub.f32 %v912_v5, %v1084_v63 }
  0x96   :  { %754 = vpow2.f32 %v381_v61 }
  0x97   :  { %v379_v6 = vmul.f32 1.442695, %v363_v3  ;;  %v383_v7 = vmul.f32 1.442695, %v365_v4 }
  0x98   :  { %v1090_v10 = vpop.xlane.xlu0 %330  ;;  %v1092_v11 = vpop.xlane.xlu1 %333 }
  0x99   :  { %756 = vpow2.f32 %v379_v6  ;;  %v366_v12 = vsub.f32 %v921_v8, %v1090_v10  ;;  %v367_v15 = vsub.f32 %v926_v9, %v1092_v11 }
  0x9a   :  { %758 = vpow2.f32 %v383_v7 }
  0x9b   :  { %v385_v16 = vmul.f32 1.442695, %v366_v12  ;;  %v387_v19 = vmul.f32 1.442695, %v367_v15 }
  0x9c   :  { %v1098_v20 = vpop.xlane.xlu0 %336  ;;  %v1100_v23 = vpop.xlane.xlu1 %339 }
  0x9d   :  { %760 = vpow2.f32 %v385_v16  ;;  %v368_v24 = vsub.f32 %v935_v13, %v1098_v20  ;;  %v369_v27 = vsub.f32 %v940_v14, %v1100_v23 }
  0x9e   :  { %762 = vpow2.f32 %v387_v19 }
  0x9f   :  { %v753_v28 = vpop.eup %752  ;;  %v389_v31 = vmul.f32 1.442695, %v368_v24  ;;  %v391_v32 = vmul.f32 1.442695, %v369_v27 }
  0xa0   :  { %v755_v35 = vpop.eup %754  ;;  %v1106_v36 = vpop.xlane.xlu0 %342  ;;  %v407_v38 = vsel %vm316_vm0, %v753_v28, 0.0 }
  0xa1   :  { %v1109_v39 = vpop.xlane.xlu1 %345  ;;  %764 = vpow2.f32 %v389_v31  ;;  %v370_v40 = vsub.f32 %v949_v17, %v1106_v36  ;;  %408 = vadd.xlane.f32.xlu1 %v407_v38  ;;  %v413_v42 = vsel %vm316_vm0, %v755_v35, 0.0 }
  0xa2   :  { %v371_v41 = vsub.f32 %v954_v18, %v1109_v39  ;;  %766 = vpow2.f32 %v391_v32 }
  0xa3   :  { %v757_v43 = vpop.eup %756  ;;  %v393_v44 = vmul.f32 1.442695, %v370_v40 }
  0xa4   :  { %v395_v45 = vmul.f32 1.442695, %v371_v41  ;;  %v759_v46 = vpop.eup %758  ;;  %v1116_v47 = vpop.xlane.xlu0 %50  ;;  %v410_v48 = vsel %vm316_vm0, %v757_v43, 0.0  ;;  %v37_v41 = vlaneseq }
  0xa5   :  { %v1119_v49 = vpop.xlane.xlu1 %53  ;;  %768 = vpow2.f32 %v393_v44  ;;  %v58_v50 = vsub.f32 %v963_v21, %v1116_v47  ;;  %414 = vadd.xlane.f32.xlu1 %v413_v42  ;;  %411 = vadd.xlane.f32.xlu0 %v410_v48  ;;  %v416_v52 = vsel %vm316_vm0, %v759_v46, 0.0 }
  0xa6   :  { %v59_v51 = vsub.f32 %v968_v22, %v1119_v49  ;;  %770 = vpow2.f32 %v395_v45 }
  0xa7   :  { %v761_v53 = vpop.eup %760  ;;  %v61_v54 = vmul.f32 1.442695, %v58_v50 }
  0xa8   :  { %v63_v55 = vmul.f32 1.442695, %v59_v51  ;;  %v763_v58 = vpop.eup %762  ;;  %v1126_v59 = vpop.xlane.xlu0 %154  ;;  %v419_v60 = vsel %vm316_vm0, %v761_v53, 0.0 }
  0xa9   :  { %v1129_v61 = vpop.xlane.xlu1 %157  ;;  %772 = vpow2.f32 %v61_v54  ;;  %v162_v3 = vsub.f32 %v977_v25, %v1126_v59  ;;  %420 = vadd.xlane.f32.xlu1 %v419_v60  ;;  %417 = vadd.xlane.f32.xlu0 %v416_v52  ;;  %v422_v6 = vsel %vm316_vm0, %v763_v58, 0.0  ;;  %v1157_v54 = vand.u32 127, %v37_v41 }
  0xaa   :  { %v163_v4 = vsub.f32 %v982_v26, %v1129_v61  ;;  %774 = vpow2.f32 %v63_v55 }
  0xab   :  { %v765_v7 = vpop.eup %764  ;;  %v165_v12 = vmul.f32 1.442695, %v162_v3 }
  0xac   :  { %v167_v15 = vmul.f32 1.442695, %v163_v4  ;;  %v767_v16 = vpop.eup %766  ;;  %v1136_v19 = vpop.xlane.xlu0 %348  ;;  %v425_v24 = vsel %vm316_vm0, %v765_v7, 0.0 }
  0xad   :  { %v1139_v27 = vpop.xlane.xlu1 %56  ;;  %776 = vpow2.f32 %v165_v12  ;;  %v372_v28 = vsub.f32 %v991_v29, %v1136_v19  ;;  %426 = vadd.xlane.f32.xlu1 %v425_v24  ;;  %423 = vadd.xlane.f32.xlu0 %v422_v6  ;;  %v428_v32 = vsel %vm316_vm0, %v767_v16, 0.0 }
  0xae   :  { %v60_v31 = vsub.f32 %v996_v30, %v1139_v27  ;;  %778 = vpow2.f32 %v167_v15 }
  0xaf   :  { %v769_v35 = vpop.eup %768  ;;  %v397_v38 = vmul.f32 1.442695, %v372_v28 }
  0xb0   :  { %v65_v40 = vmul.f32 1.442695, %v60_v31  ;;  %v771_v42 = vpop.eup %770  ;;  %v1146_v43 = vpop.xlane.xlu0 %160  ;;  %v431_v44 = vsel %vm316_vm0, %v769_v35, 0.0 }
  0xb1   :  { %v1149_v45 = vpop.xlane.xlu1 %351  ;;  %780 = vpow2.f32 %v397_v38  ;;  %v164_v46 = vsub.f32 %v1005_v33, %v1146_v43  ;;  %432 = vadd.xlane.f32.xlu1 %v431_v44  ;;  %429 = vadd.xlane.f32.xlu0 %v428_v32  ;;  %v434_v50 = vsel %vm316_vm0, %v771_v42, 0.0 }
  0xb2   :  { %v373_v48 = vsub.f32 %v1010_v34, %v1149_v45  ;;  %782 = vpow2.f32 %v65_v40 }
  0xb3   :  { %v773_v51 = vpop.eup %772  ;;  %v169_v52 = vmul.f32 1.442695, %v164_v46 }
  0xb4   :  { %v399_v53 = vmul.f32 1.442695, %v373_v48  ;;  %v775_v55 = vpop.eup %774  ;;  %v1159_v58 = vpop.xlane.xlu0 %354  ;;  %v67_v60 = vsel %vm48_vm1, %v773_v51, 0.0 }
  0xb5   :  { %784 = vpow2.f32 %v169_v52  ;;  %v374_v3 = vsub.f32 %v1019_v37, %v1159_v58  ;;  %435 = vadd.xlane.f32.xlu0 %v434_v50  ;;  %68 = vadd.xlane.f32.xlu1 %v67_v60  ;;  %v70_v4 = vsel %vm48_vm1, %v775_v55, 0.0  ;;  %v499_v6 = vpop.permute.xlu1 %498 }
  0xb6   :  { %786 = vpow2.f32 %v399_v53  ;;  %vm542_vm3 = vcmp.eq.s32.totalorder %v1157_v54, %v499_v6 }
  0xb7   :  { %v777_v7 = vpop.eup %776  ;;  %v401_v12 = vmul.f32 1.442695, %v374_v3  ;;  %v656_v28 = vsel %vm542_vm3, %v893_v0, 0.0 }
  0xb8   :  { %v779_v15 = vpop.eup %778  ;;  %v171_v16 = vsel %vm152_vm2, %v777_v7, 0.0  ;;  %v671_v40 = vsel %vm316_vm0, %v656_v28, 0.0 }
  0xb9   :  { %788 = vpow2.f32 %v401_v12  ;;  %71 = vadd.xlane.f32.xlu0 %v70_v4  ;;  %172 = vadd.xlane.f32.xlu1 %v171_v16  ;;  %v174_v24 = vsel %vm152_vm2, %v779_v15, 0.0  ;;  %v511_v53 = vpop.permute.xlu1 %510 }
  0xba   :  { %vm546_vm6 = vcmp.eq.s32.totalorder %v1157_v54, %v511_v53 }
  0xbb   :  { %v781_v31 = vpop.eup %780  ;;  %v660_v12 = vsel %vm546_vm6, %v921_v8, 0.0 }
  0xbc   :  { %v783_v32 = vpop.eup %782  ;;  %v502_v35 = vpop.permute.xlu0 %501  ;;  %v437_v38 = vsel %vm316_vm0, %v781_v31, 0.0 }
  0xbd   :  { %vm543_vm4 = vcmp.eq.s32.totalorder %v1157_v54, %v502_v35  ;;  %175 = vadd.xlane.f32.xlu0 %v174_v24  ;;  %438 = vadd.xlane.f32.xlu1 %v437_v38  ;;  %v73_v44 = vsel %vm48_vm1, %v783_v32, 0.0 }
  0xbe   :  { %v657_v42 = vsel %vm543_vm4, %v903_v2, 0.0 }
  0xbf   :  { %v785_v46 = vpop.eup %784  ;;  %v672_v48 = vsel %vm316_vm0, %v657_v42, 0.0 }
  0xc0   :  { %v787_v50 = vpop.eup %786  ;;  %v505_v0 = vpop.permute.xlu0 %504  ;;  %v177_v51 = vsel %vm152_vm2, %v785_v46, 0.0  ;;  %v673_v52 = vadd.f32 %v672_v48, %v671_v40 }
  0xc1   :  { %vm544_vm5 = vcmp.eq.s32.totalorder %v1157_v54, %v505_v0  ;;  %74 = vadd.xlane.f32.xlu0 %v73_v44  ;;  %178 = vadd.xlane.f32.xlu1 %v177_v51  ;;  %v440_v2 = vsel %vm316_vm0, %v787_v50, 0.0  ;;  %v526_v46 = vpop.permute.xlu1 %525  ;;  %v268_v50 = vld [vmem:[%s1320_s5 + $0x58] sm:$0xff] }
  0xc2   :  { %v658_v55 = vsel %vm544_vm5, %v898_v1, 0.0  ;;  %v678_v1 = vsel %vm316_vm0, %v660_v12, 0.0  ;;  %vm551_vm11 = vcmp.eq.s32.totalorder %v1157_v54, %v526_v46  ;;  %v1211_v12 = vshrl.u32 %v37_v41, 7 }
  0xc3   :  { %v789_v60 = vpop.eup %788  ;;  %v674_v3 = vsel %vm316_vm0, %v658_v55, 0.0 }
  0xc4   :  { %v508_v4 = vpop.permute.xlu0 %507  ;;  %v443_v6 = vsel %vm316_vm0, %v789_v60, 0.0  ;;  %v675_v7 = vadd.f32 %v674_v3, %v673_v52  ;;  %v269_v60 = vld [vmem:[%s1320_s5 + $0x60] sm:$0xff] }
  0xc5   :  { %vm545_vm7 = vcmp.eq.s32.totalorder %v1157_v54, %v508_v4  ;;  %441 = vadd.xlane.f32.xlu0 %v440_v2  ;;  %444 = vadd.xlane.f32.xlu1 %v443_v6  ;;  %v92_v4 = vpop.permute.xlu1 %91 }
  0xc6   :  { %v659_v15 = vsel %vm545_vm7, %v912_v5, 0.0  ;;  %vm97_vm14 = vcmp.eq.s32.totalorder %v1157_v54, %v92_v4 }
  0xc7   :  { %v676_v16 = vsel %vm316_vm0, %v659_v15, 0.0 }
  0xc8   :  { %v514_v24 = vpop.permute.xlu0 %513  ;;  %v677_v28 = vadd.f32 %v676_v16, %v675_v7 }
  0xc9   :  { %vm547_vm8 = vcmp.eq.s32.totalorder %v1157_v54, %v514_v24  ;;  %v194_v7 = vpop.permute.xlu1 %193 }
  0xca   :  { %v661_v31 = vsel %vm547_vm8, %v926_v9, 0.0  ;;  %v679_v32 = vadd.f32 %v678_v1, %v677_v28  ;;  %v1217_v1 = vadd.s32 16, %v1211_v12  ;;  %vm199_vm6 = vcmp.eq.s32.totalorder %v1157_v54, %v194_v7 }
  0xcb   :  { %v680_v35 = vsel %vm316_vm0, %v661_v31, 0.0  ;;  %v223_v31 = vsel %vm199_vm6, %v982_v26, 0.0 }
  0xcc   :  { %v517_v8 = vpop.permute.xlu0 %516  ;;  %v681_v38 = vadd.f32 %v680_v35, %v679_v32  ;;  %vm47_vm3 = vcmp.lt.s32.totalorder %v1217_v1, 20 }
  0xcd   :  { %vm548_vm9 = vcmp.eq.s32.totalorder %v1157_v54, %v517_v8  ;;  %v95_v24 = vpop.permute.xlu1 %94 }
  0xce   :  { %v662_v40 = vsel %vm548_vm9, %v935_v13, 0.0  ;;  %v665_v13 = vsel %vm551_vm11, %v954_v18, 0.0  ;;  %vm98_vm4 = vcmp.eq.s32.totalorder %v1157_v54, %v95_v24 }
  0xcf   :  { %v682_v5 = vsel %vm316_vm0, %v662_v40, 0.0  ;;  %v688_v53 = vsel %vm316_vm0, %v665_v13, 0.0  ;;  %vm107_vm8 = vmand %vm98_vm4, %vm47_vm3 }
  0xd0   :  { %v683_v42 = vadd.f32 %v682_v5, %v681_v38  ;;  %v520_v44 = vpop.permute.xlu0 %519  ;;  %v129_v38 = vsel %vm107_vm8, %v996_v30, 0.0 }
  0xd1   :  { %vm549_vm10 = vcmp.eq.s32.totalorder %v1157_v54, %v520_v44 }
  0xd2   :  { %v663_v9 = vsel %vm549_vm10, %v940_v14, 0.0 }
  0xd3   :  { %v684_v48 = vsel %vm316_vm0, %v663_v9, 0.0 }
  0xd4   :  { %v685_v0 = vadd.f32 %v684_v48, %v683_v42  ;;  %v523_v51 = vpop.permute.xlu0 %522  ;;  %v133_v42 = vsel %vm48_vm1, %v129_v38, 0.0 }
  0xd5   :  { %vm550_vm12 = vcmp.eq.s32.totalorder %v1157_v54, %v523_v51 }
  0xd6   :  { %v664_v52 = vsel %vm550_vm12, %v949_v17, 0.0  ;;  %531 = vperm.xlu1 %750, %v268_v50  }
  0xd7   :  { %v686_v55 = vsel %vm316_vm0, %v664_v52, 0.0 }
  0xd8   :  { %v687_v14 = vadd.f32 %v686_v55, %v685_v0  ;;  %v89_v2 = vpop.permute.xlu0 %88 }
  0xd9   :  { %vm96_vm15 = vcmp.eq.s32.totalorder %v1157_v54, %v89_v2 }
  0xda   :  { %v689_v3 = vadd.f32 %v688_v53, %v687_v14  ;;  %v127_v41 = vsel %vm96_vm15, %v963_v21, 0.0  ;;  %v226_v21 = vsel %vm152_vm2, %v223_v31, 0.0 }
  0xdb   :  { %534 = vperm.xlu0 %751, %v269_v60   ;;  %v130_v8 = vsel %vm48_vm1, %v127_v41, 0.0 }
  0xdc   :  { %v191_v18 = vpop.permute.xlu0 %190 }
  0xdd   :  { %vm198_vm7 = vcmp.eq.s32.totalorder %v1157_v54, %v191_v18 }
  0xde   :  { %v222_v32 = vsel %vm198_vm7, %v977_v25, 0.0 }
  0xdf   :  { %v225_v40 = vsel %vm152_vm2, %v222_v32, 0.0 }
  0xe0   :  { %v529_v6 = vpop.permute.xlu0 %528  ;;  %v227_v26 = vadd.f32 %v226_v21, %v225_v40 }
  0xe1   :  { %vm552_vm13 = vcmp.eq.s32.totalorder %v1157_v54, %v529_v6 }
  0xe2   :  { %v666_v17 = vsel %vm552_vm13, %v991_v29, 0.0  ;;  %v128_v29 = vsel %vm97_vm14, %v968_v22, 0.0  ;;  %vm28_vm13 = vcmask 0  }
  0xe3   :  { %v690_v15 = vsel %vm316_vm0, %v666_v17, 0.0  ;;  %v131_v35 = vsel %vm48_vm1, %v128_v29, 0.0  ;;  %vm111_vm1 = vcmask 7168  }
  0xe4   :  { %v1214_v16 = vadd.f32 %v690_v15, %v689_v3  ;;  %v197_v28 = vpop.permute.xlu0 %196  ;;  %v132_v5 = vadd.f32 %v131_v35, %v130_v8 }
  0xe5   :  { %vm200_vm5 = vcmp.eq.s32.totalorder %v1157_v54, %v197_v28 }
  0xe6   :  { %vm203_vm9 = vmand %vm200_vm5, %vm47_vm3  ;;  %v134_v46 = vadd.f32 %v133_v42, %v132_v5 }
  0xe7   :  { %v224_v22 = vsel %vm203_vm9, %v1005_v33, 0.0 }
  0xe8   :  { %v228_v44 = vsel %vm152_vm2, %v224_v22, 0.0 }
  0xe9   :  { %v229_v25 = vadd.f32 %v228_v44, %v227_v26 }
  0xfa   :  { %135 = vadd.xlane.f32.xlu0 %v134_v46  ;;  %230 = vadd.xlane.f32.xlu1 %v229_v25 }
 0x12e   :  { %v409_v9 = vpop.xlane.xlu1 %408 }
 0x12f   :  { %790 = vlog2.f32 %v409_v9 }
 0x132   :  { %v415_v48 = vpop.xlane.xlu1 %414  ;;  %v412_v30 = vpop.xlane.xlu0 %411 }
 0x133   :  { %792 = vlog2.f32 %v415_v48 }
 0x134   :  { %794 = vlog2.f32 %v412_v30 }
 0x136   :  { %v421_v33 = vpop.xlane.xlu1 %420  ;;  %v418_v50 = vpop.xlane.xlu0 %417 }
 0x137   :  { %796 = vlog2.f32 %v421_v33 }
 0x138   :  { %798 = vlog2.f32 %v418_v50 }
 0x139   :  { %v791_v0 = vpop.eup %790 }
 0x13a   :  { %v427_v13 = vpop.xlane.xlu1 %426  ;;  %v424_v51 = vpop.xlane.xlu0 %423  ;;  %v453_v52 = vmul.f32 0.6931472, %v791_v0 }
 0x13b   :  { %800 = vlog2.f32 %v427_v13 }
 0x13c   :  { %802 = vlog2.f32 %v424_v51  ;;  %v482_v3 = vadd.f32 %v453_v52, %v1074_v56 }
 0x13d   :  { %v793_v53 = vpop.eup %792 }
 0x13e   :  { %v795_v55 = vpop.eup %794  ;;  %v457_v14 = vmul.f32 0.6931472, %v793_v53  ;;  %v433_v2 = vpop.xlane.xlu1 %432  ;;  %v617_v29 = vsel %vm111_vm1, %v482_v3, 0.0 }
 0x13f   :  { %v430_v60 = vpop.xlane.xlu0 %429  ;;  %v455_v4 = vmul.f32 0.6931472, %v795_v55 }
 0x140   :  { %804 = vlog2.f32 %v430_v60  ;;  %v484_v6 = vadd.f32 %v457_v14, %v1076_v57 }
 0x141   :  { %v797_v18 = vpop.eup %796  ;;  %v483_v7 = vadd.f32 %v455_v4, %v1082_v62  ;;  %806 = vlog2.f32 %v433_v2 }
 0x142   :  { %v799_v17 = vpop.eup %798  ;;  %v461_v15 = vmul.f32 0.6931472, %v797_v18  ;;  %v69_v24 = vpop.xlane.xlu1 %68  ;;  %v620_v35 = vsel %vm111_vm1, %v484_v6, 0.0 }
 0x143   :  { %v436_v28 = vpop.xlane.xlu0 %435  ;;  %v618_v41 = vsel %vm111_vm1, %v483_v7, 0.0  ;;  %v459_v31 = vmul.f32 0.6931472, %v799_v17 }
 0x144   :  { %v619_v32 = vadd.f32 %v618_v41, %v617_v29  ;;  %808 = vlog2.f32 %v436_v28  ;;  %v486_v8 = vadd.f32 %v461_v15, %v1090_v10  ;;  %v282_v41 = vadd.s32 96, %v1211_v12 }
 0x145   :  { %v801_v56 = vpop.eup %800  ;;  %v485_v57 = vadd.f32 %v459_v31, %v1084_v63  ;;  %810 = vlog2.f32 %v69_v24 }
 0x146   :  { %v803_v62 = vpop.eup %802  ;;  %v621_v38 = vadd.f32 %v620_v35, %v619_v32  ;;  %v173_v22 = vpop.xlane.xlu1 %172  ;;  %v465_v5 = vmul.f32 0.6931472, %v801_v56  ;;  %v624_v26 = vsel %vm111_vm1, %v486_v8, 0.0  ;;  %vm313_vm2 = vcmp.lt.s32.totalorder %v282_v41, 100 }
 0x147   :  { %v72_v21 = vpop.xlane.xlu0 %71  ;;  %v622_v40 = vsel %vm111_vm1, %v485_v57, 0.0  ;;  %v463_v42 = vmul.f32 0.6931472, %v803_v62  ;;  %812 = vlog2.f32 %v173_v22 }
 0x148   :  { %v623_v44 = vadd.f32 %v622_v40, %v621_v38  ;;  %814 = vlog2.f32 %v72_v21  ;;  %v488_v48 = vadd.f32 %v465_v5, %v1098_v20 }
 0x149   :  { %v487_v46 = vadd.f32 %v463_v42, %v1092_v11 }
 0x14a   :  { %v805_v25 = vpop.eup %804  ;;  %v625_v10 = vadd.f32 %v624_v26, %v623_v44  ;;  %v439_v9 = vpop.xlane.xlu1 %438  ;;  %v628_v11 = vsel %vm111_vm1, %v488_v48, 0.0 }
 0x14b   :  { %v176_v63 = vpop.xlane.xlu0 %175  ;;  %v626_v30 = vsel %vm111_vm1, %v487_v46, 0.0  ;;  %v467_v33 = vmul.f32 0.6931472, %v805_v25  ;;  %816 = vlog2.f32 %v439_v9  ;;  %v807_v50 = vpop.eup %806 }
 0x14c   :  { %v627_v0 = vadd.f32 %v626_v30, %v625_v10  ;;  %818 = vlog2.f32 %v176_v63  ;;  %v469_v55 = vmul.f32 0.6931472, %v807_v50 }
 0x14d   :  { %v489_v13 = vadd.f32 %v467_v33, %v1100_v23 }
 0x14e   :  { %v809_v51 = vpop.eup %808  ;;  %v179_v52 = vpop.xlane.xlu1 %178  ;;  %v629_v2 = vadd.f32 %v628_v11, %v627_v0  ;;  %v490_v7 = vadd.f32 %v469_v55, %v1106_v36 }
 0x14f   :  { %v75_v53 = vpop.xlane.xlu0 %74  ;;  %820 = vlog2.f32 %v179_v52  ;;  %v811_v14 = vpop.eup %810  ;;  %v630_v60 = vsel %vm111_vm1, %v489_v13, 0.0  ;;  %v471_v3 = vmul.f32 0.6931472, %v809_v51 }
 0x150   :  { %822 = vlog2.f32 %v75_v53  ;;  %v631_v17 = vadd.f32 %v630_v60, %v629_v2  ;;  %v77_v15 = vmul.f32 0.6931472, %v811_v14  ;;  %v632_v35 = vsel %vm111_vm1, %v490_v7, 0.0 }
 0x151   :  { %v813_v20 = vpop.eup %812  ;;  %v491_v28 = vadd.f32 %v471_v3, %v1109_v39 }
 0x152   :  { %v815_v4 = vpop.eup %814  ;;  %v445_v18 = vpop.xlane.xlu1 %444  ;;  %v181_v29 = vmul.f32 0.6931472, %v813_v20  ;;  %v82_v36 = vadd.f32 %v77_v15, %v1116_v47  ;;  %v633_v62 = vadd.f32 %v632_v35, %v631_v17 }
 0x153   :  { %v442_v6 = vpop.xlane.xlu0 %441  ;;  %v79_v23 = vmul.f32 0.6931472, %v815_v4  ;;  %824 = vlog2.f32 %v445_v18  ;;  %v634_v22 = vsel %vm111_vm1, %v491_v28, 0.0 }
 0x154   :  { %826 = vlog2.f32 %v442_v6  ;;  %v186_v21 = vadd.f32 %v181_v29, %v1126_v59 }
 0x155   :  { %v817_v24 = vpop.eup %816  ;;  %v83_v32 = vadd.f32 %v79_v23, %v1119_v49 }
 0x156   :  { %v819_v31 = vpop.eup %818  ;;  %v473_v56 = vmul.f32 0.6931472, %v817_v24  ;;  %v532_v57 = vpop.permute.xlu1 %531  ;;  %v207_v9 = vsel %vm111_vm1, %v186_v21, 0.0 }
 0x157   :  { %v183_v8 = vmul.f32 0.6931472, %v819_v31  ;;  %vm553_vm10 = vcmp.eq.s32.totalorder %v1157_v54, %v532_v57  ;;  %v113_v42 = vsel %vm111_vm1, %v83_v32, 0.0 }
 0x158   :  { %v492_v40 = vadd.f32 %v473_v56, %v1136_v19  ;;  %v635_v19 = vadd.f32 %v634_v22, %v633_v62  ;;  %v667_v10 = vsel %vm553_vm10, %v1010_v34, 0.0 }
 0x159   :  { %v821_v38 = vpop.eup %820  ;;  %v187_v39 = vadd.f32 %v183_v8, %v1129_v61  ;;  %v112_v61 = vsel %vm111_vm1, %v82_v36, 0.0  ;;  %v692_v51 = vsel %vm316_vm0, %v667_v10, 0.0 }
 0x15a   :  { %v823_v12 = vpop.eup %822  ;;  %v185_v49 = vmul.f32 0.6931472, %v821_v38  ;;  %v535_v5 = vpop.permute.xlu0 %534  ;;  %v636_v33 = vsel %vm111_vm1, %v492_v40, 0.0  ;;  %v693_v1 = vadd.f32 %v692_v51, %v1214_v16 }
 0x15b   :  { %v81_v44 = vmul.f32 0.6931472, %v823_v12  ;;  %vm554_vm11 = vcmp.eq.s32.totalorder %v1157_v54, %v535_v5  ;;  %v208_v47 = vsel %vm111_vm1, %v187_v39, 0.0  ;;  %v114_v54 = vadd.f32 %v113_v42, %v112_v61 }
 0x15c   :  { %v188_v26 = vadd.f32 %v185_v49, %v1146_v43  ;;  %vm1274_vm12 = vmand %vm554_vm11, %vm313_vm2  ;;  %v209_v30 = vadd.f32 %v208_v47, %v207_v9  ;;  %v637_v2 = vadd.f32 %v636_v33, %v635_v19 }
 0x15d   :  { %v825_v46 = vpop.eup %824  ;;  %v84_v25 = vadd.f32 %v81_v44, %v1139_v27  ;;  %v668_v0 = vsel %vm1274_vm12, %v1019_v37, 0.0 }
 0x15e   :  { %v827_v63 = vpop.eup %826  ;;  %v477_v48 = vmul.f32 0.6931472, %v825_v46  ;;  %v206_v43 = vsel %vm47_vm3, %v188_v26, 0.0  ;;  %v694_v14 = vsel %vm316_vm0, %v668_v0, 0.0 }
 0x15f   :  { %v475_v50 = vmul.f32 0.6931472, %v827_v63  ;;  %v210_v27 = vsel %vm111_vm1, %v206_v43, 0.0  ;;  %v110_v34 = vsel %vm47_vm3, %v84_v25, 0.0  ;;  %v695_v3 = vadd.f32 %v694_v14, %v693_v1 }
 0x160   :  { %v494_v13 = vadd.f32 %v477_v48, %v1159_v58  ;;  %v211_v52 = vadd.f32 %v210_v27, %v209_v30  ;;  %v115_v53 = vsel %vm111_vm1, %v110_v34, 0.0 }
 0x161   :  { %v493_v11 = vadd.f32 %v475_v50, %v1149_v45  ;;  %v116_v55 = vadd.f32 %v115_v53, %v114_v54  ;;  %v853_v45 = vmov 0.0  }
 0x162   :  { %212 = vadd.xlane.f32.xlu0 %v211_v52  ;;  %v614_v37 = vsel %vm313_vm2, %v494_v13, 0.0  ;;  %29 = vst.msk [vmem:[#allocation2] sm:$0x1] %vm28_vm13, %v853_v45 }
 0x163   :  { %117 = vadd.xlane.f32.xlu1 %v116_v55  ;;  %v638_v20 = vsel %vm111_vm1, %v493_v11, 0.0  ;;  %v640_v58 = vsel %vm111_vm1, %v614_v37, 0.0 }
 0x164   :  { %v639_v60 = vadd.f32 %v638_v20, %v637_v2 }
 0x166   :  { %v641_v4 = vadd.f32 %v640_v58, %v639_v60 }
 0x167   :  { %700 = vadd.xlane.f32.xlu1 %v695_v3 }
 0x168   :  { %646 = vadd.xlane.f32.xlu0 %v641_v4 }
 0x169   :  { %v712_v11 = vld [vmem:[#allocation2] sm:$0x1] }
 0x187   :  { %v136_v18 = vpop.xlane.xlu0 %135  ;;  %v231_v6 = vpop.xlane.xlu1 %230 }
 0x188   :  { %v137_v7 = vrot.slane %v136_v18, 4  ;;  %v232_v23 = vrot.slane %v231_v6, 4 }
 0x18a   :  { %v138_v17 = vadd.f32 %v137_v7, %v136_v18  ;;  %v233_v15 = vadd.f32 %v232_v23, %v231_v6 }
 0x18c   :  { %v139_v24 = vrot.slane %v138_v17, 2  ;;  %v234_v31 = vrot.slane %v233_v15, 2 }
 0x18e   :  { %v140_v57 = vadd.f32 %v139_v24, %v138_v17  ;;  %v235_v39 = vadd.f32 %v234_v31, %v233_v15 }
 0x190   :  { %v141_v5 = vrot.slane %v140_v57, 1  ;;  %v236_v59 = vrot.slane %v235_v39, 1 }
 0x192   :  { %v142_v10 = vadd.f32 %v141_v5, %v140_v57  ;;  %v237_v54 = vadd.f32 %v236_v59, %v235_v39 }
 0x1ef   :  { %v213_v16 = vpop.xlane.xlu0 %212 }
 0x1f0   :  { %v118_v28 = vpop.xlane.xlu1 %117  ;;  %v214_v29 = vrot.slane %v213_v16, 4 }
 0x1f1   :  { %v119_v41 = vrot.slane %v118_v28, 4 }
 0x1f2   :  { %v215_v32 = vadd.f32 %v214_v29, %v213_v16 }
 0x1f3   :  { %v120_v56 = vadd.f32 %v119_v41, %v118_v28 }
 0x1f4   :  { %v216_v35 = vrot.slane %v215_v32, 2  ;;  %v701_v8 = vpop.xlane.xlu1 %700 }
 0x1f5   :  { %v121_v36 = vrot.slane %v120_v56, 2  ;;  %v702_v62 = vrot.slane %v701_v8, 4  ;;  %v647_v38 = vpop.xlane.xlu0 %646 }
 0x1f6   :  { %v648_v22 = vrot.slane %v647_v38, 4  ;;  %v217_v21 = vadd.f32 %v216_v35, %v215_v32 }
 0x1f7   :  { %v703_v12 = vadd.f32 %v702_v62, %v701_v8  ;;  %v122_v40 = vadd.f32 %v121_v36, %v120_v56 }
 0x1f8   :  { %v649_v49 = vadd.f32 %v648_v22, %v647_v38  ;;  %v218_v42 = vrot.slane %v217_v21, 1 }
 0x1f9   :  { %v704_v44 = vrot.slane %v703_v12, 2  ;;  %v123_v47 = vrot.slane %v122_v40, 1 }
 0x1fa   :  { %v650_v26 = vrot.slane %v649_v49, 2  ;;  %v219_v46 = vadd.f32 %v218_v42, %v217_v21 }
 0x1fb   :  { %v705_v61 = vadd.f32 %v704_v44, %v703_v12  ;;  %v124_v19 = vadd.f32 %v123_v47, %v122_v40 }
 0x1fc   :  { %v651_v25 = vadd.f32 %v650_v26, %v649_v49 }
 0x1fd   :  { %735 = vpush %v124_v19  ;;  %v706_v9 = vrot.slane %v705_v61, 1 }
 0x1fe   :  { %737 = vpush %v142_v10  ;;  %v652_v63 = vrot.slane %v651_v25, 1 }
 0x1ff   :  { %739 = vpush %v219_v46  ;;  %v707_v48 = vadd.f32 %v706_v9, %v705_v61 }
 0x200   :  { %741 = vpush %v237_v54  ;;  %v653_v43 = vadd.f32 %v652_v63, %v651_v25 }
 0x202   :  { %743 = vpush %v653_v43 }
 0x203   :  { %745 = vpush %v707_v48 }
 0x22e   :  { %s736_s5 = spop %735 }
 0x22f   :  { %v126_v30 = vstv %s736_s5  ;;  %s738_s17 = spop %737 }
 0x230   :  { %v144_v33 = vstv %s738_s17  ;;  %s740_s18 = spop %739 }
 0x231   :  { %v221_v50 = vstv %s740_s18  ;;  %s742_s19 = spop %741  ;;  %v145_v0 = vsub.f32 %v126_v30, %v144_v33 }
 0x232   :  { %v239_v27 = vstv %s742_s19 }
 0x233   :  { %v240_v34 = vsub.f32 %v221_v50, %v239_v27  ;;  %s744_s20 = spop %743 }
 0x234   :  { %v655_v13 = vstv %s744_s20  ;;  %s746_s21 = spop %745 }
 0x235   :  { %v709_v51 = vstv %s746_s21  ;;  %v241_v52 = vadd.f32 %v240_v34, %v145_v0 }
 0x236   :  { %v710_v53 = vsub.f32 %v655_v13, %v709_v51 }
 0x238   :  { %v711_v55 = vadd.f32 %v710_v53, %v241_v52 }
 0x23a   :  { %v713_v14 = vadd.f32 %v712_v11, %v711_v55 }
 0x23c   :  { %715 = vst.msk [vmem:[#allocation2] sm:$0x1] %vm28_vm13, %v713_v14 }
 0x243   :  { %v719_v37 = vld [vmem:[#allocation2] sm:$0x1] }
 0x244   :  { %720 = vst.msk [vmem:[#allocation3] sm:$0x1] %vm28_vm13, %v719_v37 }
 0x245   :  { %839 = shalt.err (!%p836_p4)
}
 0x246   :  { %s840_s28 = scalar_lea.hbm %s1321_s6, 16 }
 0x247   :  { %p841_p5 = scmp.ne.s32.totalorder %s1321_s6, %s840_s28  ;;  %p844_p6 = scmp.lt.u32.totalorder %s840_s28, %s1321_s6 }
 0x249   :  { %p846_p7 = pnand %p844_p6, %p841_p5 }
 0x24b   :  { %849 = shalt.err (!%p846_p7)
}
 0x24c   :  { %730 = dma.vmem_to_hbm [thread:$0]  %s728_s23, 16, %s1321_s6, [#allocation4]  }
 0x24d   :  { %850 = dma.done.wait [#allocation4], 16  }
 0x24e   :  { %851 = vsyncadd [#allocation4], 4294967280 }
 0x24f   :  { %734 = vsyncpa [#allocation4], 1 }

</bundles_post_ra>
